<compile_context>
chip_gen: v7x
topology: tpu7x:2x2x1
jax: 0.10.0
libtpu: 0.0.40
codegen_flags: <defaults>
</compile_context>

<pallas_src>
import functools
import math

import jax
import jax.numpy as jnp
from jax.experimental import pallas as pl
from jax.experimental.pallas import tpu as pltpu

GAMMA = 0.1        # RBF bandwidth
_LANE = 128        # lane width / MXU alignment
_SUB = 8           # sublane width
_TB_MAX_DEFAULT = 256


def _round_up(n, m):
    return ((n + m - 1) // m) * m


def _vmem_capacity_bytes():
    try:
        return int(pltpu.get_tpu_info().vmem_capacity_bytes)
    except Exception:
        return 64 << 20  # conservative (v7x per-TC VMEM)


def _supports_single_buffering():
    if not hasattr(pl, "Buffered"):
        return False
    try:
        pl.BlockSpec((_SUB, _LANE), lambda i: (0, 0), pipeline_mode=pl.Buffered(1))
        return True
    except Exception:
        return False


_HAS_BUFFERED = _supports_single_buffering()


def _spec(block_shape, index_map, *, invariant=False, single_buffer=False):
    """BlockSpec; grid-invariant blocks optionally get a single VMEM buffer."""
    if invariant and single_buffer:
        return pl.BlockSpec(block_shape, index_map, pipeline_mode=pl.Buffered(1))
    return pl.BlockSpec(block_shape, index_map)


def _encoder_kernel(x_ref, xt_ref, ngxn_ref, u_ref, o_ref, acc_ref, xn_ref, *, gamma):
    # x_ref:    [TB, Fp]  batch tile of inputs (matmul dtype)
    # xt_ref:   [Fp, TM]  pre-transposed landmark slab (matmul dtype)
    # ngxn_ref: [1,  TM]  f32, hoisted -gamma * ||X_m||^2 slab
    # u_ref:    [TM, Dp]  projection slab (matmul dtype)
    # o_ref:    [TB, Dp]  f32 output tile
    # acc_ref:  [TB, Dp]  f32 accumulator scratch
    # xn_ref:   [TB, 1]   f32 ||x_b||^2 scratch (computed once per batch tile)
    m = pl.program_id(1)

    @pl.when(m == 0)
    def _():
        acc_ref[...] = jnp.zeros_like(acc_ref)
        xf = x_ref[...].astype(jnp.float32)
        xn_ref[...] = jnp.sum(xf * xf, axis=-1, keepdims=True)

    # cross[b, m] = x_b . X_m  — MXU in natural [m,k]x[k,n] form, f32 accumulation.
    cross = jnp.dot(x_ref[...], xt_ref[...], preferred_element_type=jnp.float32)

    # -gamma * ||x_b - X_m||^2 (f32, cancellation-sensitive path); exp on the EUP.
    s = (2.0 * gamma) * cross - gamma * xn_ref[...] + ngxn_ref[...]
    phi = jnp.exp(jnp.minimum(s, 0.0))                      # d2 >= 0 guard

    acc_ref[...] += jnp.dot(phi.astype(u_ref.dtype), u_ref[...],
                            preferred_element_type=jnp.float32)

    @pl.when(m == pl.num_programs(1) - 1)
    def _():
        o_ref[...] = acc_ref[...]


def prepare_kernelized_encoder(X, U, *, gamma=GAMMA, matmul_dtype=None,
                               tb_max=_TB_MAX_DEFAULT, vmem_budget_bytes=None):
    """One-time parameter prep (pad, transpose, landmark norms, M-slab choice).

    Call once per (X, U); the result is reused by kernelized_encoder_apply.
    """
    M, F = X.shape
    M2, D = U.shape
    assert M == M2, "X and U must share the landmark dimension"

    param_dtype = jnp.dtype(U.dtype)
    mm_dtype = jnp.dtype(matmul_dtype) if matmul_dtype is not None else param_dtype

    Fp = _round_up(F, _LANE)
    Dp = _round_up(D, _LANE)
    Mp128 = _round_up(M, _LANE)

    isz = mm_dtype.itemsize
    vmem_cap = _vmem_capacity_bytes()
    if vmem_budget_bytes is None:
        vmem_budget_bytes = max(vmem_cap - (16 << 20), vmem_cap // 2)

    def footprint(tm, tb):
        return (2 * tb * Fp * isz          # x tile (double-buffered)
                + 2 * Fp * tm * isz        # X^T slab
                + 2 * _SUB * tm * 4        # -gamma*||X||^2 slab (padded to 8 sublanes)
                + 2 * tm * Dp * isz        # U slab
                + 2 * tb * Dp * 4          # f32 output tile
                + tb * Dp * 4              # f32 accumulator scratch
                + tb * _LANE * 4)          # ||x||^2 scratch (padded)

    # Pick the largest lane-multiple M-slab that fits the VMEM budget.
    tm = Mp128
    while tm > _LANE and footprint(tm, tb_max) > vmem_budget_bytes:
        tm = max(_LANE, _round_up(tm // 2, _LANE))

    Mp = _round_up(M, tm)

    Xf = jnp.asarray(X, jnp.float32)
    Uf = jnp.asarray(U)

    # Zero padding is exact: padded feature cols add 0 to dots/norms; padded
    # landmark rows have zero U rows and finite phi (<= 1), so contribute 0.
    Xt = jnp.zeros((Fp, Mp), mm_dtype).at[:F, :M].set(
        jnp.transpose(Xf).astype(mm_dtype))                        # [Fp, Mp]
    Up = jnp.zeros((Mp, Dp), mm_dtype).at[:M, :D].set(Uf.astype(mm_dtype))
    ngxn = jnp.zeros((1, Mp), jnp.float32).at[0, :M].set(
        (-gamma) * jnp.sum(Xf * Xf, axis=-1))                      # -gamma*||X_m||^2

    return dict(Xt=Xt, Up=Up, ngxn=ngxn, gamma=float(gamma),
                param_dtype=param_dtype, mm_dtype=mm_dtype,
                F=F, D=D, Fp=Fp, Dp=Dp, Mp=Mp, tm=int(tm),
                tb_max=int(tb_max), vmem_cap=int(vmem_cap))


def kernelized_encoder_apply(params, x):
    """z = exp(-gamma * ||x - X||^2) @ U  (float32), via a Pallas TPU kernel."""
    B, F = x.shape
    assert F == params["F"], "feature dim mismatch with prepared landmarks"
    Fp, Dp, Mp, tm = params["Fp"], params["Dp"], params["Mp"], params["tm"]
    Xt, Up, ngxn = params["Xt"], params["Up"], params["ngxn"]
    gamma = params["gamma"]
    mm_dtype = params["mm_dtype"]
    D = params["D"]

    # Module semantics: x = x.to(U.dtype) before kernel evaluation.
    x = x.astype(params["param_dtype"]).astype(mm_dtype)
    if Fp != F:
        x = jnp.pad(x, ((0, 0), (0, Fp - F)))  # feature padding only; no B round-trip

    tb = min(params["tb_max"], _round_up(max(B, 1), _SUB))
    n_b = pl.cdiv(B, tb)
    n_m = Mp // tm

    isz = jnp.dtype(mm_dtype).itemsize
    vmem_need = (2 * tb * Fp * isz + 2 * Fp * tm * isz + 2 * _SUB * tm * 4
                 + 2 * tm * Dp * isz + 2 * tb * Dp * 4 + tb * Dp * 4 + tb * _LANE * 4)
    vmem_limit = int(min(max(vmem_need + (4 << 20), 32 << 20), params["vmem_cap"]))

    cost = pl.CostEstimate(
        flops=2 * B * Mp * Fp + 2 * B * Mp * Dp,
        transcendentals=B * Mp,
        bytes_accessed=int(x.size * isz + n_b * (Xt.size + Up.size) * isz
                           + n_b * ngxn.size * 4 + B * Dp * 4),
    )

    def run(single_buffer):
        in_specs = [
            _spec((tb, Fp), lambda i, m: (i, 0),           # batch tile of x
                  invariant=(n_b == 1), single_buffer=single_buffer),
            _spec((Fp, tm), lambda i, m: (0, m),           # X^T slab
                  invariant=(n_m == 1), single_buffer=single_buffer),
            _spec((1, tm), lambda i, m: (0, m),            # -gamma*||X||^2 slab
                  invariant=(n_m == 1), single_buffer=single_buffer),
            _spec((tm, Dp), lambda i, m: (m, 0),           # U slab
                  invariant=(n_m == 1), single_buffer=single_buffer),
        ]
        return pl.pallas_call(
            functools.partial(_encoder_kernel, gamma=gamma),
            out_shape=jax.ShapeDtypeStruct((B, Dp), jnp.float32),
            grid_spec=pltpu.PrefetchScalarGridSpec(
                num_scalar_prefetch=0,
                grid=(n_b, n_m),
                in_specs=in_specs,
                out_specs=pl.BlockSpec((tb, Dp), lambda i, m: (i, 0)),
                scratch_shapes=[pltpu.VMEM((tb, Dp), jnp.float32),   # accumulator
                                pltpu.VMEM((tb, 1), jnp.float32)],   # ||x||^2
            ),
            compiler_params=pltpu.CompilerParams(
                dimension_semantics=("parallel", "arbitrary"),
                vmem_limit_bytes=vmem_limit,
            ),
            cost_estimate=cost,
        )(x, Xt, ngxn, Up)

    if _HAS_BUFFERED:
        try:
            out = run(True)
        except Exception:
            out = run(False)   # fallback: default double-buffering everywhere
    else:
        out = run(False)

    return out[:, :D] if Dp != D else out


def kernelized_encoder_full(x, X, U, *, gamma=GAMMA, matmul_dtype=None):
    """Convenience wrapper (prep + apply). Prefer caching prepare_* for repeated calls."""
    params = prepare_kernelized_encoder(X, U, gamma=gamma, matmul_dtype=matmul_dtype)
    return kernelized_encoder_apply(params, x)


if __name__ == "__main__":
    key = jax.random.PRNGKey(0)
    k1, k2, k3 = jax.random.split(key, 3)

    B, F, M, D = 8, 32, 64, 32
    x = jax.random.normal(k1, (B, F), dtype=jnp.float32)
    # Deterministic "parameters" of the module (synthetic init, no checkpoint):
    X = jax.random.normal(k2, (M, F), dtype=jnp.float32)                 # landmarks
    U = jax.random.normal(k3, (M, D), dtype=jnp.float32) / math.sqrt(M)  # projection

    params = prepare_kernelized_encoder(X, U, gamma=GAMMA)   # one-time prep
    z = kernelized_encoder_apply(params, x)
    jax.block_until_ready(z)

    # Pure-JAX reference (RBF kernel + projection, same as the PyTorch forward)
    d2_ref = jnp.sum((x[:, None, :] - X[None, :, :]) ** 2, axis=-1)
    z_ref = (jnp.exp(-GAMMA * d2_ref) @ U).astype(jnp.float32)

    assert z.shape == (B, D) and z.dtype == jnp.float32
    assert jnp.allclose(z, z_ref, atol=1e-4, rtol=1e-4), "mismatch vs reference"
    print("KERNEL_OK")
</pallas_src>

<mosaic_0001>
module attributes {stable_mosaic.version = 11 : i64} {
  func.func @_encoder_kernel(%arg0: i32, %arg1: i32, %arg2: memref<8x128xf32, #tpu.memory_space<vmem>>, %arg3: memref<128x128xf32, #tpu.memory_space<vmem>>, %arg4: memref<1x128xf32, #tpu.memory_space<vmem>>, %arg5: memref<128x128xf32, #tpu.memory_space<vmem>>, %arg6: memref<8x128xf32, #tpu.memory_space<vmem>>, %arg7: memref<8x128xf32, #tpu.memory_space<vmem>>, %arg8: memref<8x1xf32, #tpu.memory_space<vmem>>) attributes {dimension_semantics = [#tpu.dimension_semantics<parallel>, #tpu.dimension_semantics<arbitrary>], iteration_bounds = array<i64: 1, 1>, scalar_prefetch = 0 : i64, scratch_operands = 2 : i64, tpu.core_type = #tpu.core_type<tc>, window_params = [{pipeline_mode = #tpu.pipeline_mode<synchronous>, transform_indices = @transform_0, window_bounds = array<i64: 8, 128>}, {pipeline_mode = #tpu.pipeline_mode<synchronous>, transform_indices = @transform_1, window_bounds = array<i64: 128, 128>}, {pipeline_mode = #tpu.pipeline_mode<synchronous>, transform_indices = @transform_2, window_bounds = array<i64: 1, 128>}, {pipeline_mode = #tpu.pipeline_mode<synchronous>, transform_indices = @transform_3, window_bounds = array<i64: 128, 128>}, {transform_indices = @transform_4, window_bounds = array<i64: 8, 128>}]} {
    %c0_i32 = arith.constant 0 : i32
    %0 = arith.cmpi eq, %arg1, %c0_i32 : i32
    %1 = arith.extui %0 : i1 to i32
    %c0_i32_0 = arith.constant 0 : i32
    %2 = arith.cmpi ne, %1, %c0_i32_0 : i32
    scf.if %2 {
      %cst_20 = arith.constant 0.000000e+00 : f32
      %27 = vector.broadcast %cst_20 : f32 to vector<8x128xf32>
      %c0_21 = arith.constant 0 : index
      %c0_22 = arith.constant 0 : index
      %28 = vector.load %arg7[%c0_21, %c0_22] : memref<8x128xf32, #tpu.memory_space<vmem>>, vector<8x128xf32>
      tpu.vector_store %arg7[%c0_21, %c0_22], %27 {strides = array<i32>} : memref<8x128xf32, #tpu.memory_space<vmem>>, vector<8x128xf32>,
      %c0_23 = arith.constant 0 : index
      %c0_24 = arith.constant 0 : index
      %29 = vector.load %arg2[%c0_23, %c0_24] : memref<8x128xf32, #tpu.memory_space<vmem>>, vector<8x128xf32>
      %30 = arith.mulf %29, %29 : vector<8x128xf32>
      %cst_25 = arith.constant dense<0.000000e+00> : vector<8xf32>
      %31 = vector.multi_reduction <add>, %30, %cst_25 [1] : vector<8x128xf32> to vector<8xf32>
      %32 = vector.shape_cast %31 : vector<8xf32> to vector<8x1xf32>
      %c0_26 = arith.constant 0 : index
      %c0_27 = arith.constant 0 : index
      %33 = vector.load %arg8[%c0_26, %c0_27] : memref<8x1xf32, #tpu.memory_space<vmem>>, vector<8x1xf32>
      tpu.vector_store %arg8[%c0_26, %c0_27], %32 {strides = array<i32>} : memref<8x1xf32, #tpu.memory_space<vmem>>, vector<8x1xf32>,
    } else {
    }
    %c0 = arith.constant 0 : index
    %c0_1 = arith.constant 0 : index
    %3 = vector.load %arg2[%c0, %c0_1] : memref<8x128xf32, #tpu.memory_space<vmem>>, vector<8x128xf32>
    %c0_2 = arith.constant 0 : index
    %c0_3 = arith.constant 0 : index
    %4 = vector.load %arg3[%c0_2, %c0_3] : memref<128x128xf32, #tpu.memory_space<vmem>>, vector<128x128xf32>
    %cst = arith.constant dense<0.000000e+00> : vector<8x128xf32>
    %5 = tpu.matmul %3, %4, %cst {dimension_numbers = #tpu.dot_dimension_numbers<[1], [0], [0], [1], [0, 0, 1, 1], [], []>} : vector<8x128xf32>, vector<128x128xf32>, vector<8x128xf32> -> vector<8x128xf32>
    %cst_4 = arith.constant 2.000000e-01 : f32
    %6 = vector.broadcast %cst_4 : f32 to vector<8x128xf32>
    %7 = arith.mulf %6, %5 : vector<8x128xf32>
    %c0_5 = arith.constant 0 : index
    %c0_6 = arith.constant 0 : index
    %8 = vector.load %arg8[%c0_5, %c0_6] : memref<8x1xf32, #tpu.memory_space<vmem>>, vector<8x1xf32>
    %cst_7 = arith.constant 1.000000e-01 : f32
    %9 = vector.broadcast %cst_7 : f32 to vector<8x1xf32>
    %10 = arith.mulf %9, %8 : vector<8x1xf32>
    %11 = vector.broadcast %10 : vector<8x1xf32> to vector<8x128xf32>
    %12 = arith.subf %7, %11 : vector<8x128xf32>
    %c0_8 = arith.constant 0 : index
    %c0_9 = arith.constant 0 : index
    %13 = vector.load %arg4[%c0_8, %c0_9] : memref<1x128xf32, #tpu.memory_space<vmem>>, vector<1x128xf32>
    %14 = vector.broadcast %13 : vector<1x128xf32> to vector<8x128xf32>
    %15 = arith.addf %12, %14 : vector<8x128xf32>
    %cst_10 = arith.constant 0.000000e+00 : f32
    %16 = vector.broadcast %cst_10 : f32 to vector<8x128xf32>
    %17 = arith.minimumf %15, %16 : vector<8x128xf32>
    %18 = math.exp %17 : vector<8x128xf32>
    %c0_11 = arith.constant 0 : index
    %c0_12 = arith.constant 0 : index
    %19 = vector.load %arg7[%c0_11, %c0_12] : memref<8x128xf32, #tpu.memory_space<vmem>>, vector<8x128xf32>
    %c0_13 = arith.constant 0 : index
    %c0_14 = arith.constant 0 : index
    %20 = vector.load %arg5[%c0_13, %c0_14] : memref<128x128xf32, #tpu.memory_space<vmem>>, vector<128x128xf32>
    %cst_15 = arith.constant dense<0.000000e+00> : vector<8x128xf32>
    %21 = tpu.matmul %18, %20, %cst_15 {dimension_numbers = #tpu.dot_dimension_numbers<[1], [0], [0], [1], [0, 0, 1, 1], [], []>} : vector<8x128xf32>, vector<128x128xf32>, vector<8x128xf32> -> vector<8x128xf32>
    %22 = arith.addf %19, %21 : vector<8x128xf32>
    %c0_16 = arith.constant 0 : index
    %c0_17 = arith.constant 0 : index
    %23 = vector.load %arg7[%c0_16, %c0_17] : memref<8x128xf32, #tpu.memory_space<vmem>>, vector<8x128xf32>
    tpu.vector_store %arg7[%c0_16, %c0_17], %22 {strides = array<i32>} : memref<8x128xf32, #tpu.memory_space<vmem>>, vector<8x128xf32>,
    %c0_i32_18 = arith.constant 0 : i32
    %24 = arith.cmpi eq, %arg1, %c0_i32_18 : i32
    %25 = arith.extui %24 : i1 to i32
    %c0_i32_19 = arith.constant 0 : i32
    %26 = arith.cmpi ne, %25, %c0_i32_19 : i32
    scf.if %26 {
      %c0_20 = arith.constant 0 : index
      %c0_21 = arith.constant 0 : index
      %27 = vector.load %arg7[%c0_20, %c0_21] : memref<8x128xf32, #tpu.memory_space<vmem>>, vector<8x128xf32>
      %c0_22 = arith.constant 0 : index
      %c0_23 = arith.constant 0 : index
      %28 = vector.load %arg6[%c0_22, %c0_23] : memref<8x128xf32, #tpu.memory_space<vmem>>, vector<8x128xf32>
      tpu.vector_store %arg6[%c0_22, %c0_23], %27 {strides = array<i32>} : memref<8x128xf32, #tpu.memory_space<vmem>>, vector<8x128xf32>,
    } else {
    }
    return
  }
  func.func @transform_0(%arg0: i32, %arg1: i32) -> (i32, i32) {
    %c0_i32 = arith.constant 0 : i32
    %c0_i32_0 = arith.constant 0 : i32
    return %arg0, %c0_i32 : i32, i32
  }
  func.func @transform_1(%arg0: i32, %arg1: i32) -> (i32, i32) {
    %c0_i32 = arith.constant 0 : i32
    %c0_i32_0 = arith.constant 0 : i32
    return %c0_i32, %arg1 : i32, i32
  }
  func.func @transform_2(%arg0: i32, %arg1: i32) -> (i32, i32) {
    %c0_i32 = arith.constant 0 : i32
    %c0_i32_0 = arith.constant 0 : i32
    return %c0_i32, %arg1 : i32, i32
  }
  func.func @transform_3(%arg0: i32, %arg1: i32) -> (i32, i32) {
    %c0_i32 = arith.constant 0 : i32
    %c0_i32_0 = arith.constant 0 : i32
    return %arg1, %c0_i32 : i32, i32
  }
  func.func @transform_4(%arg0: i32, %arg1: i32) -> (i32, i32) {
    %c0_i32 = arith.constant 0 : i32
    %c0_i32_0 = arith.constant 0 : i32
    return %arg0, %c0_i32 : i32, i32
  }
}

module attributes {stable_mosaic.version = 11 : i64} {
  func.func @_encoder_kernel(%arg0: i32, %arg1: i32, %arg2: memref<8x128xf32, #tpu.memory_space<vmem>>, %arg3: memref<128x128xf32, #tpu.memory_space<vmem>>, %arg4: memref<1x128xf32, #tpu.memory_space<vmem>>, %arg5: memref<128x128xf32, #tpu.memory_space<vmem>>, %arg6: memref<8x128xf32, #tpu.memory_space<vmem>>, %arg7: memref<8x128xf32, #tpu.memory_space<vmem>>, %arg8: memref<8x1xf32, #tpu.memory_space<vmem>>) attributes {dimension_semantics = [#tpu.dimension_semantics<parallel>, #tpu.dimension_semantics<arbitrary>], iteration_bounds = array<i64: 1, 1>, scalar_prefetch = 0 : i64, scratch_operands = 2 : i64, tpu.core_type = #tpu.core_type<tc>, window_params = [{transform_indices = @transform_0, window_bounds = array<i64: 8, 128>}, {transform_indices = @transform_1, window_bounds = array<i64: 128, 128>}, {transform_indices = @transform_2, window_bounds = array<i64: 1, 128>}, {transform_indices = @transform_3, window_bounds = array<i64: 128, 128>}, {transform_indices = @transform_4, window_bounds = array<i64: 8, 128>}]} {
    %c0_i32 = arith.constant 0 : i32
    %0 = arith.cmpi eq, %arg1, %c0_i32 : i32
    %1 = arith.extui %0 : i1 to i32
    %c0_i32_0 = arith.constant 0 : i32
    %2 = arith.cmpi ne, %1, %c0_i32_0 : i32
    scf.if %2 {
      %cst_20 = arith.constant 0.000000e+00 : f32
      %27 = vector.broadcast %cst_20 : f32 to vector<8x128xf32>
      %c0_21 = arith.constant 0 : index
      %c0_22 = arith.constant 0 : index
      %28 = vector.load %arg7[%c0_21, %c0_22] : memref<8x128xf32, #tpu.memory_space<vmem>>, vector<8x128xf32>
      tpu.vector_store %arg7[%c0_21, %c0_22], %27 {strides = array<i32>} : memref<8x128xf32, #tpu.memory_space<vmem>>, vector<8x128xf32>,
      %c0_23 = arith.constant 0 : index
      %c0_24 = arith.constant 0 : index
      %29 = vector.load %arg2[%c0_23, %c0_24] : memref<8x128xf32, #tpu.memory_space<vmem>>, vector<8x128xf32>
      %30 = arith.mulf %29, %29 : vector<8x128xf32>
      %cst_25 = arith.constant dense<0.000000e+00> : vector<8xf32>
      %31 = vector.multi_reduction <add>, %30, %cst_25 [1] : vector<8x128xf32> to vector<8xf32>
      %32 = vector.shape_cast %31 : vector<8xf32> to vector<8x1xf32>
      %c0_26 = arith.constant 0 : index
      %c0_27 = arith.constant 0 : index
      %33 = vector.load %arg8[%c0_26, %c0_27] : memref<8x1xf32, #tpu.memory_space<vmem>>, vector<8x1xf32>
      tpu.vector_store %arg8[%c0_26, %c0_27], %32 {strides = array<i32>} : memref<8x1xf32, #tpu.memory_space<vmem>>, vector<8x1xf32>,
    } else {
    }
    %c0 = arith.constant 0 : index
    %c0_1 = arith.constant 0 : index
    %3 = vector.load %arg2[%c0, %c0_1] : memref<8x128xf32, #tpu.memory_space<vmem>>, vector<8x128xf32>
    %c0_2 = arith.constant 0 : index
    %c0_3 = arith.constant 0 : index
    %4 = vector.load %arg3[%c0_2, %c0_3] : memref<128x128xf32, #tpu.memory_space<vmem>>, vector<128x128xf32>
    %cst = arith.constant dense<0.000000e+00> : vector<8x128xf32>
    %5 = tpu.matmul %3, %4, %cst {dimension_numbers = #tpu.dot_dimension_numbers<[1], [0], [0], [1], [0, 0, 1, 1], [], []>} : vector<8x128xf32>, vector<128x128xf32>, vector<8x128xf32> -> vector<8x128xf32>
    %cst_4 = arith.constant 2.000000e-01 : f32
    %6 = vector.broadcast %cst_4 : f32 to vector<8x128xf32>
    %7 = arith.mulf %6, %5 : vector<8x128xf32>
    %c0_5 = arith.constant 0 : index
    %c0_6 = arith.constant 0 : index
    %8 = vector.load %arg8[%c0_5, %c0_6] : memref<8x1xf32, #tpu.memory_space<vmem>>, vector<8x1xf32>
    %cst_7 = arith.constant 1.000000e-01 : f32
    %9 = vector.broadcast %cst_7 : f32 to vector<8x1xf32>
    %10 = arith.mulf %9, %8 : vector<8x1xf32>
    %11 = vector.broadcast %10 : vector<8x1xf32> to vector<8x128xf32>
    %12 = arith.subf %7, %11 : vector<8x128xf32>
    %c0_8 = arith.constant 0 : index
    %c0_9 = arith.constant 0 : index
    %13 = vector.load %arg4[%c0_8, %c0_9] : memref<1x128xf32, #tpu.memory_space<vmem>>, vector<1x128xf32>
    %14 = vector.broadcast %13 : vector<1x128xf32> to vector<8x128xf32>
    %15 = arith.addf %12, %14 : vector<8x128xf32>
    %cst_10 = arith.constant 0.000000e+00 : f32
    %16 = vector.broadcast %cst_10 : f32 to vector<8x128xf32>
    %17 = arith.minimumf %15, %16 : vector<8x128xf32>
    %18 = math.exp %17 : vector<8x128xf32>
    %c0_11 = arith.constant 0 : index
    %c0_12 = arith.constant 0 : index
    %19 = vector.load %arg7[%c0_11, %c0_12] : memref<8x128xf32, #tpu.memory_space<vmem>>, vector<8x128xf32>
    %c0_13 = arith.constant 0 : index
    %c0_14 = arith.constant 0 : index
    %20 = vector.load %arg5[%c0_13, %c0_14] : memref<128x128xf32, #tpu.memory_space<vmem>>, vector<128x128xf32>
    %cst_15 = arith.constant dense<0.000000e+00> : vector<8x128xf32>
    %21 = tpu.matmul %18, %20, %cst_15 {dimension_numbers = #tpu.dot_dimension_numbers<[1], [0], [0], [1], [0, 0, 1, 1], [], []>} : vector<8x128xf32>, vector<128x128xf32>, vector<8x128xf32> -> vector<8x128xf32>
    %22 = arith.addf %19, %21 : vector<8x128xf32>
    %c0_16 = arith.constant 0 : index
    %c0_17 = arith.constant 0 : index
    %23 = vector.load %arg7[%c0_16, %c0_17] : memref<8x128xf32, #tpu.memory_space<vmem>>, vector<8x128xf32>
    tpu.vector_store %arg7[%c0_16, %c0_17], %22 {strides = array<i32>} : memref<8x128xf32, #tpu.memory_space<vmem>>, vector<8x128xf32>,
    %c0_i32_18 = arith.constant 0 : i32
    %24 = arith.cmpi eq, %arg1, %c0_i32_18 : i32
    %25 = arith.extui %24 : i1 to i32
    %c0_i32_19 = arith.constant 0 : i32
    %26 = arith.cmpi ne, %25, %c0_i32_19 : i32
    scf.if %26 {
      %c0_20 = arith.constant 0 : index
      %c0_21 = arith.constant 0 : index
      %27 = vector.load %arg7[%c0_20, %c0_21] : memref<8x128xf32, #tpu.memory_space<vmem>>, vector<8x128xf32>
      %c0_22 = arith.constant 0 : index
      %c0_23 = arith.constant 0 : index
      %28 = vector.load %arg6[%c0_22, %c0_23] : memref<8x128xf32, #tpu.memory_space<vmem>>, vector<8x128xf32>
      tpu.vector_store %arg6[%c0_22, %c0_23], %27 {strides = array<i32>} : memref<8x128xf32, #tpu.memory_space<vmem>>, vector<8x128xf32>,
    } else {
    }
    return
  }
  func.func @transform_0(%arg0: i32, %arg1: i32) -> (i32, i32) {
    %c0_i32 = arith.constant 0 : i32
    %c0_i32_0 = arith.constant 0 : i32
    return %arg0, %c0_i32 : i32, i32
  }
  func.func @transform_1(%arg0: i32, %arg1: i32) -> (i32, i32) {
    %c0_i32 = arith.constant 0 : i32
    %c0_i32_0 = arith.constant 0 : i32
    return %c0_i32, %arg1 : i32, i32
  }
  func.func @transform_2(%arg0: i32, %arg1: i32) -> (i32, i32) {
    %c0_i32 = arith.constant 0 : i32
    %c0_i32_0 = arith.constant 0 : i32
    return %c0_i32, %arg1 : i32, i32
  }
  func.func @transform_3(%arg0: i32, %arg1: i32) -> (i32, i32) {
    %c0_i32 = arith.constant 0 : i32
    %c0_i32_0 = arith.constant 0 : i32
    return %arg1, %c0_i32 : i32, i32
  }
  func.func @transform_4(%arg0: i32, %arg1: i32) -> (i32, i32) {
    %c0_i32 = arith.constant 0 : i32
    %c0_i32_0 = arith.constant 0 : i32
    return %arg0, %c0_i32 : i32, i32
  }
}

</mosaic_0001>

<bundles_post_ra>
// kernel: tpu_custom_call.1
= control target key start
LH: loop header
LB: loop body
LE: loop exit
PB: predicated region body
PF: predicated region fallthrough
CT: control target
= control target key end

     0   :  { %9 = vsyncpa [#allocation5], 0  ;;  %s653_s0 = inlined_call_operand.hbm [shape: f32[8,128], index: 0, kind: input, shape index: {}]   ;;  %s654_s1 = inlined_call_operand.hbm [shape: f32[128,128], index: 1, kind: input, shape index: {}]   ;;  %s655_s2 = inlined_call_operand.vmem [shape: f32[1,128], index: 2, kind: input, shape index: {}]   ;;  %s656_s3 = inlined_call_operand.hbm [shape: f32[128,128], index: 3, kind: input, shape index: {}]   ;;  %s657_s4 = inlined_call_operand.hbm [shape: f32[8,128], index: 4, kind: output, shape index: {}]  }
   0x1   :  { %10 = vsyncpa [#allocation8], 0 }
   0x2   :  { %11 = vsyncpa [#allocation6], 0  ;;  %s545_s15 = smov [#allocation7]   ;;  %s451_s19 = scalar_lea.hbm %s654_s1, 2048 }
   0x3   :  { %s27_s16 = sshll.u32 %s545_s15, 4  ;;  %p452_p0 = scmp.ne.s32.totalorder %s654_s1, %s451_s19  ;;  %s28_s16 = int_to_ptr.vmem [resolvable:$true] %s27_s16 }
   0x4   :  { %p455_p1 = scmp.lt.u32.totalorder %s451_s19, %s654_s1 }
   0x6   :  { %p457_p2 = pnand %p455_p1, %p452_p0 }
   0x8   :  { %460 = shalt.err (!%p457_p2)
}
   0x9   :  { %s461_s24 = scalar_lea.vmem %s28_s16, 2048  ;;  %p466_p4 = scmp.lt.s32.totalorder %s28_s16, %s28_s16 }
   0xa   :  { %p462_p3 = scmp.ne.s32.totalorder %s28_s16, %s461_s24  ;;  %p467_p5 = scmp.lt.s32.totalorder %s461_s24, %s461_s24 }
   0xc   :  { %p468_p6 = por %p467_p5, %p466_p4 }
   0xe   :  { %p469_p7 = pnand %p468_p6, %p462_p3 }
  0x10   :  { %472 = shalt.err (!%p469_p7)
}
  0x11   :  { %s546_s25 = smov 128   ;;  %s547_s26 = smov 8  }
  0x12   :  { %33 = dma.hbm_to_vmem [thread:$0]  %s654_s1, 2048, %s28_s16, [#allocation8], %s546_s25, %s546_s25, %s547_s26  }
  0x13   :  { %s548_s29 = smov [#allocation4]   ;;  %s549_s5 = smov [#allocation9]  }
  0x14   :  { %s18_s30 = sshll.u32 %s548_s29, 4  ;;  %s41_s6 = sshll.u32 %s549_s5, 4  ;;  %s19_s30 = int_to_ptr.vmem [resolvable:$true] %s18_s30  ;;  %s42_s6 = int_to_ptr.vmem [resolvable:$true] %s41_s6 }
  0x15   :  { %s473_s9 = scalar_lea.hbm %s653_s0, 128 }
  0x16   :  { %p474_p8 = scmp.ne.s32.totalorder %s653_s0, %s473_s9  ;;  %p477_p9 = scmp.lt.u32.totalorder %s473_s9, %s653_s0 }
  0x18   :  { %p479_p10 = pnand %p477_p9, %p474_p8 }
  0x1a   :  { %482 = shalt.err (!%p479_p10)
}
  0x1b   :  { %s483_s1 = scalar_lea.vmem %s19_s30, 128  ;;  %p488_p12 = scmp.lt.s32.totalorder %s19_s30, %s19_s30 }
  0x1c   :  { %p484_p11 = scmp.ne.s32.totalorder %s19_s30, %s483_s1  ;;  %p489_p13 = scmp.lt.s32.totalorder %s483_s1, %s483_s1 }
  0x1e   :  { %p490_p0 = por %p489_p13, %p488_p12 }
  0x20   :  { %p491_p1 = pnand %p490_p0, %p484_p11 }
  0x22   :  { %494 = shalt.err (!%p491_p1)
}
  0x23   :  { %21 = dma.hbm_to_vmem [thread:$0]  %s653_s0, 128, %s19_s30, [#allocation5]  }
  0x24   :  { %s495_s18 = scalar_lea.hbm %s656_s3, 2048 }
  0x25   :  { %p496_p2 = scmp.ne.s32.totalorder %s656_s3, %s495_s18  ;;  %p499_p3 = scmp.lt.u32.totalorder %s495_s18, %s656_s3 }
  0x27   :  { %p501_p4 = pnand %p499_p3, %p496_p2 }
  0x29   :  { %504 = shalt.err (!%p501_p4)
}
  0x2a   :  { %s505_s23 = scalar_lea.vmem %s42_s6, 2048  ;;  %p510_p6 = scmp.lt.s32.totalorder %s42_s6, %s42_s6 }
  0x2b   :  { %p506_p5 = scmp.ne.s32.totalorder %s42_s6, %s505_s23  ;;  %p511_p7 = scmp.lt.s32.totalorder %s505_s23, %s505_s23 }
  0x2d   :  { %p512_p8 = por %p511_p7, %p510_p6 }
  0x2f   :  { %p513_p9 = pnand %p512_p8, %p506_p5 }
  0x31   :  { %516 = shalt.err (!%p513_p9)
}
  0x32   :  { %47 = dma.hbm_to_vmem [thread:$0]  %s656_s3, 2048, %s42_s6, [#allocation8], %s546_s25, %s546_s25, %s547_s26  }
  0x33   :  { %539 = dma.done.wait [#allocation5], 128  }
  0x34   :  { %540 = vsyncadd [#allocation5], 4294967168 }
  0x35   :  { %541 = dma.done.wait [#allocation8], 4096  }
  0x36   :  { %542 = vsyncadd [#allocation8], 4294963200  ;;  %v550_v0 = vmov 0.0|0.0   ;;  %vm551_vm0 = vmmov 0   ;;  %v552_v1 = vmov 0.0   ;;  %v62_v2 = vld [vmem:[#allocation4] sm:$0xff] }
  0x37   :  { %390 = vmatprep.subr.bf16.mxu0 %v550_v0  ;;  %352 = vmatprep.mubr.msk.f32.mxu0 %vm551_vm0, %v552_v1  ;;  %v69_v3 = vld [vmem:[#allocation7] sm:$0xff]  ;;  %v70_v4 = vld [vmem:[#allocation7 + $0x8] sm:$0xff]  ;;  %v63_v5 = vmul.f32 %v62_v2, %v62_v2  ;;  %v71_v7 = vld [vmem:[#allocation7 + $0x10] sm:$0xff]  ;;  %v553_v21 = vmov 0   ;;  %vm66_vm1 = vcmask 7168   ;;  %s554_s26 = smov [#allocation10]  }
  0x38   :  { %414 = vmatprep.subr.bf16.mxu1 %v550_v0  ;;  %387 = vmatprep.mubr.msk.f32.mxu1 %vm551_vm0, %v552_v1  ;;  %v391_v6 = vpack.c.bf16 %v70_v4, %v69_v3  ;;  %v72_v8 = vld [vmem:[#allocation7 + $0x18] sm:$0xff]  ;;  %v73_v10 = vld [vmem:[#allocation7 + $0x20] sm:$0xff]  ;;  %v74_v11 = vld [vmem:[#allocation7 + $0x28] sm:$0xff]  ;;  %s275_s27 = sshll.u32 %s554_s26, 4  ;;  %s276_s27 = int_to_ptr.vmem [resolvable:$true] %s275_s27 }
  0x39   :  { %64 = vadd.xlane.f32.xlu0 %v63_v5  ;;  %v394_v9 = vpack.c.bf16 %v72_v8, %v71_v7  ;;  %v397_v12 = vpack.c.bf16 %v74_v11, %v73_v10  ;;  %v75_v13 = vld [vmem:[#allocation7 + $0x30] sm:$0xff]  ;;  %v76_v14 = vld [vmem:[#allocation7 + $0x38] sm:$0xff]  ;;  %v77_v16 = vld [vmem:[#allocation7 + $0x40] sm:$0xff]  ;;  %s517_s28 = scalar_lea.vmem %s276_s27, 128  ;;  %p522_p11 = scmp.lt.s32.totalorder %s276_s27, %s276_s27 }
  0x3a   :  { %392 = vmatpush3.bf16.msra.mxu0 %v391_v6  ;;  %v400_v15 = vpack.c.bf16 %v76_v14, %v75_v13  ;;  %v78_v17 = vld [vmem:[#allocation7 + $0x48] sm:$0xff]  ;;  %v79_v19 = vld [vmem:[#allocation7 + $0x50] sm:$0xff]  ;;  %v80_v20 = vld [vmem:[#allocation7 + $0x58] sm:$0xff]  ;;  %448 = vset.pattern.permute.xlu0 %v553_v21  ;;  %p518_p10 = scmp.ne.s32.totalorder %s276_s27, %s517_s28  ;;  %p523_p12 = scmp.lt.s32.totalorder %s517_s28, %s517_s28 }
  0x3b   :  { %393 = vmatprep.subr.bf16.mxu0 %v550_v0  ;;  %v403_v18 = vpack.c.bf16 %v78_v17, %v77_v16  ;;  %v406_v22 = vpack.c.bf16 %v80_v20, %v79_v19  ;;  %v81_v23 = vld [vmem:[#allocation7 + $0x60] sm:$0xff]  ;;  %v82_v24 = vld [vmem:[#allocation7 + $0x68] sm:$0xff]  ;;  %v83_v26 = vld [vmem:[#allocation7 + $0x70] sm:$0xff] }
  0x3c   :  { %v409_v25 = vpack.c.bf16 %v82_v24, %v81_v23  ;;  %v84_v27 = vld [vmem:[#allocation7 + $0x78] sm:$0xff]  ;;  %v176_v29 = vld [vmem:[#allocation9] sm:$0xff]  ;;  %v177_v30 = vld [vmem:[#allocation9 + $0x8] sm:$0xff]  ;;  %p524_p13 = por %p523_p12, %p522_p11 }
  0x3d   :  { %v412_v28 = vpack.c.bf16 %v84_v27, %v83_v26  ;;  %v178_v31 = vld [vmem:[#allocation9 + $0x10] sm:$0xff]  ;;  %v415_v32 = vpack.c.bf16 %v177_v30, %v176_v29  ;;  %v179_v33 = vld [vmem:[#allocation9 + $0x18] sm:$0xff]  ;;  %v180_v35 = vld [vmem:[#allocation9 + $0x20] sm:$0xff] }
  0x3e   :  { %395 = vmatpush3.bf16.msra.mxu0 %v394_v9  ;;  %v418_v34 = vpack.c.bf16 %v179_v33, %v178_v31  ;;  %v181_v36 = vld [vmem:[#allocation9 + $0x28] sm:$0xff]  ;;  %v182_v40 = vld [vmem:[#allocation9 + $0x30] sm:$0xff]  ;;  %v183_v41 = vld [vmem:[#allocation9 + $0x38] sm:$0xff]  ;;  %p525_p0 = pnand %p524_p13, %p518_p10 }
  0x3f   :  { %396 = vmatprep.subr.bf16.mxu0 %v550_v0  ;;  %416 = vmatpush3.bf16.msra.mxu1 %v415_v32  ;;  %v421_v37 = vpack.c.bf16 %v181_v36, %v180_v35  ;;  %v424_v43 = vpack.c.bf16 %v183_v41, %v182_v40  ;;  %v184_v44 = vld [vmem:[#allocation9 + $0x40] sm:$0xff]  ;;  %v185_v45 = vld [vmem:[#allocation9 + $0x48] sm:$0xff]  ;;  %v186_v47 = vld [vmem:[#allocation9 + $0x50] sm:$0xff] }
  0x40   :  { %417 = vmatprep.subr.bf16.mxu1 %v550_v0  ;;  %v427_v46 = vpack.c.bf16 %v185_v45, %v184_v44  ;;  %v187_v48 = vld [vmem:[#allocation9 + $0x58] sm:$0xff]  ;;  %v188_v50 = vld [vmem:[#allocation9 + $0x60] sm:$0xff]  ;;  %v189_v51 = vld [vmem:[#allocation9 + $0x68] sm:$0xff] }
  0x41   :  { %v430_v49 = vpack.c.bf16 %v187_v48, %v186_v47  ;;  %v433_v52 = vpack.c.bf16 %v189_v51, %v188_v50  ;;  %v190_v53 = vld [vmem:[#allocation9 + $0x70] sm:$0xff]  ;;  %v191_v54 = vld [vmem:[#allocation9 + $0x78] sm:$0xff] }
  0x42   :  { %398 = vmatpush3.bf16.msra.mxu0 %v397_v12  ;;  %v436_v55 = vpack.c.bf16 %v191_v54, %v190_v53  ;;  %v285_v59 = vld [vmem:[%s655_s2] ss:$0 sm:$0xff] }
  0x43   :  { %399 = vmatprep.subr.bf16.mxu0 %v550_v0  ;;  %419 = vmatpush3.bf16.msra.mxu1 %v418_v34 }
  0x44   :  { %420 = vmatprep.subr.bf16.mxu1 %v550_v0 }
  0x46   :  { %401 = vmatpush3.bf16.msra.mxu0 %v400_v15 }
  0x47   :  { %402 = vmatprep.subr.bf16.mxu0 %v550_v0  ;;  %422 = vmatpush3.bf16.msra.mxu1 %v421_v37 }
  0x48   :  { %423 = vmatprep.subr.bf16.mxu1 %v550_v0 }
  0x4a   :  { %404 = vmatpush3.bf16.msra.mxu0 %v403_v18 }
  0x4b   :  { %405 = vmatprep.subr.bf16.mxu0 %v550_v0  ;;  %425 = vmatpush3.bf16.msra.mxu1 %v424_v43 }
  0x4c   :  { %426 = vmatprep.subr.bf16.mxu1 %v550_v0 }
  0x4e   :  { %407 = vmatpush3.bf16.msra.mxu0 %v406_v22 }
  0x4f   :  { %408 = vmatprep.subr.bf16.mxu0 %v550_v0  ;;  %428 = vmatpush3.bf16.msra.mxu1 %v427_v46 }
  0x50   :  { %429 = vmatprep.subr.bf16.mxu1 %v550_v0 }
  0x52   :  { %410 = vmatpush3.bf16.msra.mxu0 %v409_v25 }
  0x53   :  { %411 = vmatprep.subr.bf16.mxu0 %v550_v0  ;;  %431 = vmatpush3.bf16.msra.mxu1 %v430_v49 }
  0x54   :  { %432 = vmatprep.subr.bf16.mxu1 %v550_v0 }
  0x56   :  { %413 = vmatpush3.bf16.msra.mxu0 %v412_v28 }
  0x57   :  { %434 = vmatpush3.bf16.msra.mxu1 %v433_v52 }
  0x58   :  { %435 = vmatprep.subr.bf16.mxu1 %v550_v0 }
  0x59   :  { %353 = vmatmul.mubr.f32.vlgmr.msra.gmra.mrb[0].mxu0 %v62_v2 }
  0x5b   :  { %437 = vmatpush3.bf16.msra.mxu1 %v436_v55 }
  0xc6   :  { %v65_v38 = vpop.xlane.xlu0 %64 }
  0xc7   :  { %67 = vst.msk [vmem:[#allocation3] sm:$0xff] %vm66_vm1, %v65_v38 }
  0xce   :  { %v156_v39 = vld [vmem:[#allocation3] sm:$0xff] }
  0xcf   :  { %v157_v42 = vmul.f32 0.1, %v156_v39 }
  0xd1   :  { %160 = vperm.xlu0 %448, %v157_v42  }
 0x12c   :  { %v151_v56 = vpop.f32.mrb[0].mxu0 }
 0x12d   :  { %v354_v57 = vpop.f32.mrb[1].mxu0  ;;  %v155_v58 = vmul.f32 0.2, %v151_v56 }
 0x150   :  { %v161_v60 = vpop.permute.xlu0 %160 }
 0x151   :  { %v163_v61 = vsub.f32 %v155_v58, %v161_v60 }
 0x153   :  { %v171_v62 = vadd.f32 %v285_v59, %v163_v61 }
 0x155   :  { %v172_v63 = vmin.f32 %v171_v62, 0.0 }
 0x157   :  { %v173_v1 = vmul.f32 1.442695, %v172_v63 }
 0x159   :  { %449 = vpow2.f32 %v173_v1 }
 0x163   :  { %v450_v2 = vpop.eup %449 }
 0x164   :  { %388 = vmatmul.mubr.f32.vlgmr.msra.gmra.mrb[0].mxu1 %v450_v2 }
 0x237   :  { %v258_v0 = vpop.f32.mrb[0].mxu1 }
 0x238   :  { %268 = vst [vmem:[#allocation10] sm:$0xff] %v258_v0  ;;  %v389_v3 = vpop.f32.mrb[1].mxu1 }
 0x239   :  { %528 = shalt.err (!%p525_p0)
}
 0x23a   :  { %s529_s30 = scalar_lea.hbm %s657_s4, 128 }
 0x23b   :  { %p530_p1 = scmp.ne.s32.totalorder %s657_s4, %s529_s30  ;;  %p533_p2 = scmp.lt.u32.totalorder %s529_s30, %s657_s4 }
 0x23d   :  { %p535_p3 = pnand %p533_p2, %p530_p1 }
 0x23f   :  { %538 = shalt.err (!%p535_p3)
}
 0x240   :  { %278 = dma.vmem_to_hbm [thread:$0]  %s276_s27, 128, %s657_s4, [#allocation6]  }
 0x241   :  { %543 = dma.done.wait [#allocation6], 128  }
 0x242   :  { %544 = vsyncadd [#allocation6], 4294967168 }
 0x243   :  { %282 = vsyncpa [#allocation5], 1 }
 0x244   :  { %283 = vsyncpa [#allocation8], 1 }
 0x245   :  { %284 = vsyncpa [#allocation6], 1 }

// kernel: tpu_custom_call.1
= control target key start
LH: loop header
LB: loop body
LE: loop exit
PB: predicated region body
PF: predicated region fallthrough
CT: control target
= control target key end

     0   :  { %9 = vsyncpa [#allocation5], 0  ;;  %s653_s0 = inlined_call_operand.hbm [shape: f32[8,128], index: 0, kind: input, shape index: {}]   ;;  %s654_s1 = inlined_call_operand.hbm [shape: f32[128,128], index: 1, kind: input, shape index: {}]   ;;  %s655_s2 = inlined_call_operand.vmem [shape: f32[1,128], index: 2, kind: input, shape index: {}]   ;;  %s656_s3 = inlined_call_operand.hbm [shape: f32[128,128], index: 3, kind: input, shape index: {}]   ;;  %s657_s4 = inlined_call_operand.hbm [shape: f32[8,128], index: 4, kind: output, shape index: {}]  }
   0x1   :  { %10 = vsyncpa [#allocation8], 0 }
   0x2   :  { %11 = vsyncpa [#allocation6], 0  ;;  %s545_s15 = smov [#allocation7]   ;;  %s451_s19 = scalar_lea.hbm %s654_s1, 2048 }
   0x3   :  { %s27_s16 = sshll.u32 %s545_s15, 4  ;;  %p452_p0 = scmp.ne.s32.totalorder %s654_s1, %s451_s19  ;;  %s28_s16 = int_to_ptr.vmem [resolvable:$true] %s27_s16 }
   0x4   :  { %p455_p1 = scmp.lt.u32.totalorder %s451_s19, %s654_s1 }
   0x6   :  { %p457_p2 = pnand %p455_p1, %p452_p0 }
   0x8   :  { %460 = shalt.err (!%p457_p2)
}
   0x9   :  { %s461_s24 = scalar_lea.vmem %s28_s16, 2048  ;;  %p466_p4 = scmp.lt.s32.totalorder %s28_s16, %s28_s16 }
   0xa   :  { %p462_p3 = scmp.ne.s32.totalorder %s28_s16, %s461_s24  ;;  %p467_p5 = scmp.lt.s32.totalorder %s461_s24, %s461_s24 }
   0xc   :  { %p468_p6 = por %p467_p5, %p466_p4 }
   0xe   :  { %p469_p7 = pnand %p468_p6, %p462_p3 }
  0x10   :  { %472 = shalt.err (!%p469_p7)
}
  0x11   :  { %s546_s25 = smov 128   ;;  %s547_s26 = smov 8  }
  0x12   :  { %33 = dma.hbm_to_vmem [thread:$0]  %s654_s1, 2048, %s28_s16, [#allocation8], %s546_s25, %s546_s25, %s547_s26  }
  0x13   :  { %s548_s29 = smov [#allocation4]   ;;  %s549_s5 = smov [#allocation9]  }
  0x14   :  { %s18_s30 = sshll.u32 %s548_s29, 4  ;;  %s41_s6 = sshll.u32 %s549_s5, 4  ;;  %s19_s30 = int_to_ptr.vmem [resolvable:$true] %s18_s30  ;;  %s42_s6 = int_to_ptr.vmem [resolvable:$true] %s41_s6 }
  0x15   :  { %s473_s9 = scalar_lea.hbm %s653_s0, 128 }
  0x16   :  { %p474_p8 = scmp.ne.s32.totalorder %s653_s0, %s473_s9  ;;  %p477_p9 = scmp.lt.u32.totalorder %s473_s9, %s653_s0 }
  0x18   :  { %p479_p10 = pnand %p477_p9, %p474_p8 }
  0x1a   :  { %482 = shalt.err (!%p479_p10)
}
  0x1b   :  { %s483_s1 = scalar_lea.vmem %s19_s30, 128  ;;  %p488_p12 = scmp.lt.s32.totalorder %s19_s30, %s19_s30 }
  0x1c   :  { %p484_p11 = scmp.ne.s32.totalorder %s19_s30, %s483_s1  ;;  %p489_p13 = scmp.lt.s32.totalorder %s483_s1, %s483_s1 }
  0x1e   :  { %p490_p0 = por %p489_p13, %p488_p12 }
  0x20   :  { %p491_p1 = pnand %p490_p0, %p484_p11 }
  0x22   :  { %494 = shalt.err (!%p491_p1)
}
  0x23   :  { %21 = dma.hbm_to_vmem [thread:$0]  %s653_s0, 128, %s19_s30, [#allocation5]  }
  0x24   :  { %s495_s18 = scalar_lea.hbm %s656_s3, 2048 }
  0x25   :  { %p496_p2 = scmp.ne.s32.totalorder %s656_s3, %s495_s18  ;;  %p499_p3 = scmp.lt.u32.totalorder %s495_s18, %s656_s3 }
  0x27   :  { %p501_p4 = pnand %p499_p3, %p496_p2 }
  0x29   :  { %504 = shalt.err (!%p501_p4)
}
  0x2a   :  { %s505_s23 = scalar_lea.vmem %s42_s6, 2048  ;;  %p510_p6 = scmp.lt.s32.totalorder %s42_s6, %s42_s6 }
  0x2b   :  { %p506_p5 = scmp.ne.s32.totalorder %s42_s6, %s505_s23  ;;  %p511_p7 = scmp.lt.s32.totalorder %s505_s23, %s505_s23 }
  0x2d   :  { %p512_p8 = por %p511_p7, %p510_p6 }
  0x2f   :  { %p513_p9 = pnand %p512_p8, %p506_p5 }
  0x31   :  { %516 = shalt.err (!%p513_p9)
}
  0x32   :  { %47 = dma.hbm_to_vmem [thread:$0]  %s656_s3, 2048, %s42_s6, [#allocation8], %s546_s25, %s546_s25, %s547_s26  }
  0x33   :  { %539 = dma.done.wait [#allocation5], 128  }
  0x34   :  { %540 = vsyncadd [#allocation5], 4294967168 }
  0x35   :  { %541 = dma.done.wait [#allocation8], 4096  }
  0x36   :  { %542 = vsyncadd [#allocation8], 4294963200  ;;  %v550_v0 = vmov 0.0|0.0   ;;  %vm551_vm0 = vmmov 0   ;;  %v552_v1 = vmov 0.0   ;;  %v62_v2 = vld [vmem:[#allocation4] sm:$0xff] }
  0x37   :  { %390 = vmatprep.subr.bf16.mxu0 %v550_v0  ;;  %352 = vmatprep.mubr.msk.f32.mxu0 %vm551_vm0, %v552_v1  ;;  %v69_v3 = vld [vmem:[#allocation7] sm:$0xff]  ;;  %v70_v4 = vld [vmem:[#allocation7 + $0x8] sm:$0xff]  ;;  %v63_v5 = vmul.f32 %v62_v2, %v62_v2  ;;  %v71_v7 = vld [vmem:[#allocation7 + $0x10] sm:$0xff]  ;;  %v553_v21 = vmov 0   ;;  %vm66_vm1 = vcmask 7168   ;;  %s554_s26 = smov [#allocation10]  }
  0x38   :  { %414 = vmatprep.subr.bf16.mxu1 %v550_v0  ;;  %387 = vmatprep.mubr.msk.f32.mxu1 %vm551_vm0, %v552_v1  ;;  %v391_v6 = vpack.c.bf16 %v70_v4, %v69_v3  ;;  %v72_v8 = vld [vmem:[#allocation7 + $0x18] sm:$0xff]  ;;  %v73_v10 = vld [vmem:[#allocation7 + $0x20] sm:$0xff]  ;;  %v74_v11 = vld [vmem:[#allocation7 + $0x28] sm:$0xff]  ;;  %s275_s27 = sshll.u32 %s554_s26, 4  ;;  %s276_s27 = int_to_ptr.vmem [resolvable:$true] %s275_s27 }
  0x39   :  { %64 = vadd.xlane.f32.xlu0 %v63_v5  ;;  %v394_v9 = vpack.c.bf16 %v72_v8, %v71_v7  ;;  %v397_v12 = vpack.c.bf16 %v74_v11, %v73_v10  ;;  %v75_v13 = vld [vmem:[#allocation7 + $0x30] sm:$0xff]  ;;  %v76_v14 = vld [vmem:[#allocation7 + $0x38] sm:$0xff]  ;;  %v77_v16 = vld [vmem:[#allocation7 + $0x40] sm:$0xff]  ;;  %s517_s28 = scalar_lea.vmem %s276_s27, 128  ;;  %p522_p11 = scmp.lt.s32.totalorder %s276_s27, %s276_s27 }
  0x3a   :  { %392 = vmatpush3.bf16.msra.mxu0 %v391_v6  ;;  %v400_v15 = vpack.c.bf16 %v76_v14, %v75_v13  ;;  %v78_v17 = vld [vmem:[#allocation7 + $0x48] sm:$0xff]  ;;  %v79_v19 = vld [vmem:[#allocation7 + $0x50] sm:$0xff]  ;;  %v80_v20 = vld [vmem:[#allocation7 + $0x58] sm:$0xff]  ;;  %448 = vset.pattern.permute.xlu0 %v553_v21  ;;  %p518_p10 = scmp.ne.s32.totalorder %s276_s27, %s517_s28  ;;  %p523_p12 = scmp.lt.s32.totalorder %s517_s28, %s517_s28 }
  0x3b   :  { %393 = vmatprep.subr.bf16.mxu0 %v550_v0  ;;  %v403_v18 = vpack.c.bf16 %v78_v17, %v77_v16  ;;  %v406_v22 = vpack.c.bf16 %v80_v20, %v79_v19  ;;  %v81_v23 = vld [vmem:[#allocation7 + $0x60] sm:$0xff]  ;;  %v82_v24 = vld [vmem:[#allocation7 + $0x68] sm:$0xff]  ;;  %v83_v26 = vld [vmem:[#allocation7 + $0x70] sm:$0xff] }
  0x3c   :  { %v409_v25 = vpack.c.bf16 %v82_v24, %v81_v23  ;;  %v84_v27 = vld [vmem:[#allocation7 + $0x78] sm:$0xff]  ;;  %v176_v29 = vld [vmem:[#allocation9] sm:$0xff]  ;;  %v177_v30 = vld [vmem:[#allocation9 + $0x8] sm:$0xff]  ;;  %p524_p13 = por %p523_p12, %p522_p11 }
  0x3d   :  { %v412_v28 = vpack.c.bf16 %v84_v27, %v83_v26  ;;  %v178_v31 = vld [vmem:[#allocation9 + $0x10] sm:$0xff]  ;;  %v415_v32 = vpack.c.bf16 %v177_v30, %v176_v29  ;;  %v179_v33 = vld [vmem:[#allocation9 + $0x18] sm:$0xff]  ;;  %v180_v35 = vld [vmem:[#allocation9 + $0x20] sm:$0xff] }
  0x3e   :  { %395 = vmatpush3.bf16.msra.mxu0 %v394_v9  ;;  %v418_v34 = vpack.c.bf16 %v179_v33, %v178_v31  ;;  %v181_v36 = vld [vmem:[#allocation9 + $0x28] sm:$0xff]  ;;  %v182_v40 = vld [vmem:[#allocation9 + $0x30] sm:$0xff]  ;;  %v183_v41 = vld [vmem:[#allocation9 + $0x38] sm:$0xff]  ;;  %p525_p0 = pnand %p524_p13, %p518_p10 }
  0x3f   :  { %396 = vmatprep.subr.bf16.mxu0 %v550_v0  ;;  %416 = vmatpush3.bf16.msra.mxu1 %v415_v32  ;;  %v421_v37 = vpack.c.bf16 %v181_v36, %v180_v35  ;;  %v424_v43 = vpack.c.bf16 %v183_v41, %v182_v40  ;;  %v184_v44 = vld [vmem:[#allocation9 + $0x40] sm:$0xff]  ;;  %v185_v45 = vld [vmem:[#allocation9 + $0x48] sm:$0xff]  ;;  %v186_v47 = vld [vmem:[#allocation9 + $0x50] sm:$0xff] }
  0x40   :  { %417 = vmatprep.subr.bf16.mxu1 %v550_v0  ;;  %v427_v46 = vpack.c.bf16 %v185_v45, %v184_v44  ;;  %v187_v48 = vld [vmem:[#allocation9 + $0x58] sm:$0xff]  ;;  %v188_v50 = vld [vmem:[#allocation9 + $0x60] sm:$0xff]  ;;  %v189_v51 = vld [vmem:[#allocation9 + $0x68] sm:$0xff] }
  0x41   :  { %v430_v49 = vpack.c.bf16 %v187_v48, %v186_v47  ;;  %v433_v52 = vpack.c.bf16 %v189_v51, %v188_v50  ;;  %v190_v53 = vld [vmem:[#allocation9 + $0x70] sm:$0xff]  ;;  %v191_v54 = vld [vmem:[#allocation9 + $0x78] sm:$0xff] }
  0x42   :  { %398 = vmatpush3.bf16.msra.mxu0 %v397_v12  ;;  %v436_v55 = vpack.c.bf16 %v191_v54, %v190_v53  ;;  %v285_v59 = vld [vmem:[%s655_s2] ss:$0 sm:$0xff] }
  0x43   :  { %399 = vmatprep.subr.bf16.mxu0 %v550_v0  ;;  %419 = vmatpush3.bf16.msra.mxu1 %v418_v34 }
  0x44   :  { %420 = vmatprep.subr.bf16.mxu1 %v550_v0 }
  0x46   :  { %401 = vmatpush3.bf16.msra.mxu0 %v400_v15 }
  0x47   :  { %402 = vmatprep.subr.bf16.mxu0 %v550_v0  ;;  %422 = vmatpush3.bf16.msra.mxu1 %v421_v37 }
  0x48   :  { %423 = vmatprep.subr.bf16.mxu1 %v550_v0 }
  0x4a   :  { %404 = vmatpush3.bf16.msra.mxu0 %v403_v18 }
  0x4b   :  { %405 = vmatprep.subr.bf16.mxu0 %v550_v0  ;;  %425 = vmatpush3.bf16.msra.mxu1 %v424_v43 }
  0x4c   :  { %426 = vmatprep.subr.bf16.mxu1 %v550_v0 }
  0x4e   :  { %407 = vmatpush3.bf16.msra.mxu0 %v406_v22 }
  0x4f   :  { %408 = vmatprep.subr.bf16.mxu0 %v550_v0  ;;  %428 = vmatpush3.bf16.msra.mxu1 %v427_v46 }
  0x50   :  { %429 = vmatprep.subr.bf16.mxu1 %v550_v0 }
  0x52   :  { %410 = vmatpush3.bf16.msra.mxu0 %v409_v25 }
  0x53   :  { %411 = vmatprep.subr.bf16.mxu0 %v550_v0  ;;  %431 = vmatpush3.bf16.msra.mxu1 %v430_v49 }
  0x54   :  { %432 = vmatprep.subr.bf16.mxu1 %v550_v0 }
  0x56   :  { %413 = vmatpush3.bf16.msra.mxu0 %v412_v28 }
  0x57   :  { %434 = vmatpush3.bf16.msra.mxu1 %v433_v52 }
  0x58   :  { %435 = vmatprep.subr.bf16.mxu1 %v550_v0 }
  0x59   :  { %353 = vmatmul.mubr.f32.vlgmr.msra.gmra.mrb[0].mxu0 %v62_v2 }
  0x5b   :  { %437 = vmatpush3.bf16.msra.mxu1 %v436_v55 }
  0xc6   :  { %v65_v38 = vpop.xlane.xlu0 %64 }
  0xc7   :  { %67 = vst.msk [vmem:[#allocation3] sm:$0xff] %vm66_vm1, %v65_v38 }
  0xce   :  { %v156_v39 = vld [vmem:[#allocation3] sm:$0xff] }
  0xcf   :  { %v157_v42 = vmul.f32 0.1, %v156_v39 }
  0xd1   :  { %160 = vperm.xlu0 %448, %v157_v42  }
 0x12c   :  { %v151_v56 = vpop.f32.mrb[0].mxu0 }
 0x12d   :  { %v354_v57 = vpop.f32.mrb[1].mxu0  ;;  %v155_v58 = vmul.f32 0.2, %v151_v56 }
 0x150   :  { %v161_v60 = vpop.permute.xlu0 %160 }
 0x151   :  { %v163_v61 = vsub.f32 %v155_v58, %v161_v60 }
 0x153   :  { %v171_v62 = vadd.f32 %v285_v59, %v163_v61 }
 0x155   :  { %v172_v63 = vmin.f32 %v171_v62, 0.0 }
 0x157   :  { %v173_v1 = vmul.f32 1.442695, %v172_v63 }
 0x159   :  { %449 = vpow2.f32 %v173_v1 }
 0x163   :  { %v450_v2 = vpop.eup %449 }
 0x164   :  { %388 = vmatmul.mubr.f32.vlgmr.msra.gmra.mrb[0].mxu1 %v450_v2 }
 0x237   :  { %v258_v0 = vpop.f32.mrb[0].mxu1 }
 0x238   :  { %268 = vst [vmem:[#allocation10] sm:$0xff] %v258_v0  ;;  %v389_v3 = vpop.f32.mrb[1].mxu1 }
 0x239   :  { %528 = shalt.err (!%p525_p0)
}
 0x23a   :  { %s529_s30 = scalar_lea.hbm %s657_s4, 128 }
 0x23b   :  { %p530_p1 = scmp.ne.s32.totalorder %s657_s4, %s529_s30  ;;  %p533_p2 = scmp.lt.u32.totalorder %s529_s30, %s657_s4 }
 0x23d   :  { %p535_p3 = pnand %p533_p2, %p530_p1 }
 0x23f   :  { %538 = shalt.err (!%p535_p3)
}
 0x240   :  { %278 = dma.vmem_to_hbm [thread:$0]  %s276_s27, 128, %s657_s4, [#allocation6]  }
 0x241   :  { %543 = dma.done.wait [#allocation6], 128  }
 0x242   :  { %544 = vsyncadd [#allocation6], 4294967168 }
 0x243   :  { %282 = vsyncpa [#allocation5], 1 }
 0x244   :  { %283 = vsyncpa [#allocation8], 1 }
 0x245   :  { %284 = vsyncpa [#allocation6], 1 }

</bundles_post_ra>
